<compile_context>
chip_gen: v7x
topology: tpu7x:2x2x1
jax: 0.10.0
libtpu: 0.0.40
codegen_flags: <defaults>
</compile_context>

<pallas_src>
import functools

import jax
import jax.numpy as jnp
from jax import lax
from jax.experimental import pallas as pl
from jax.experimental.pallas import tpu as pltpu


def _round_up(x: int, m: int) -> int:
    return ((x + m - 1) // m) * m


def _make_logreg_kernel(num_classes: int):
    """Kernel closure over the (static) number of real classes."""

    def kernel(x_ref, w_ref, b_ref, t_ref, out_ref, acc_ref):
        # x_ref  : VMEM (tb, tk)  compute_dtype  input row tile, k-th feature slab
        # w_ref  : VMEM (tk, CP)  compute_dtype  weight slab (host-transposed, class-padded)
        # b_ref  : VMEM (1, CP)   f32            bias (class-padded with zeros)
        # t_ref  : VMEM (tb, 1)   int32          targets for this row tile
        # out_ref: VMEM (tb, CP)  f32            cols [0,C) = logits, col C = per-row CE loss
        # acc_ref: VMEM (tb, CP)  f32            matmul accumulator (lives across k steps)
        k = pl.program_id(1)

        @pl.when(k == 0)
        def _init():
            acc_ref[...] = jnp.zeros_like(acc_ref)

        # K-tiled matmul; accumulate in f32 regardless of the compute dtype.
        acc_ref[...] += lax.dot_general(
            x_ref[...], w_ref[...],
            dimension_numbers=(((1,), (0,)), ((), ())),
            preferred_element_type=jnp.float32,
        )

        @pl.when(k == pl.num_programs(1) - 1)
        def _finalize():
            logits = acc_ref[...] + b_ref[...]                      # (tb, CP) f32
            tb, cp = logits.shape
            lane = lax.broadcasted_iota(jnp.int32, (tb, cp), 1)     # class index per lane

            # Stable log-sum-exp over real classes only (padded lanes -> -inf,
            # exp(-inf) = 0 so they drop out of the sum).
            masked = jnp.where(lane < num_classes, logits, -jnp.inf)
            m = jnp.max(masked, axis=-1, keepdims=True)             # (tb, 1)
            lse = m + jnp.log(jnp.sum(jnp.exp(masked - m), axis=-1, keepdims=True))

            # Vectorized target gather: one compare + one select, independent of tb.
            # TODO(synk): out-of-range / negative targets silently yield a target
            # logit of 0 instead of raising like torch.nn.CrossEntropyLoss.
            tgt = t_ref[...]                                        # (tb, 1) int32
            tgt_logit = jnp.sum(jnp.where(lane == tgt, logits, 0.0),
                                axis=-1, keepdims=True)             # (tb, 1)
            row_loss = lse - tgt_logit                              # (tb, 1)

            # Single lane-dense (unmasked) store: logits plus the loss column.
            out_ref[...] = jnp.where(lane == num_classes, row_loss, logits)

    return kernel


def logreg_forward(x, weight, bias, targets, *,
                   block_rows: int = 256,
                   block_k: int = 512,
                   compute_dtype=jnp.float32):
    """x: (B, F) f32, weight: (C, F) f32 (PyTorch nn.Linear layout),
    bias: (C,) f32 or None, targets: (B,) int. Returns (loss scalar, logits (B, C)).

    block_rows:    batch rows per grid step (rounded to a multiple of 8; ~128 for v5e,
                   256 for v6e/v7x).
    block_k:       feature-axis tile; if F > block_k the kernel K-tiles with an f32
                   accumulator (bounds VMEM for large F, e.g. v7x's 64 MiB).
    compute_dtype: dtype of the matmul inputs (jnp.bfloat16 recommended on v6e/v7x);
                   accumulation and softmax/loss math are always f32.
    """
    x = x.astype(jnp.float32)
    B, F = x.shape
    C = weight.shape[0]

    # Lane-dense class dimension + one spare lane for the per-row loss column.
    CP = _round_up(C + 1, 128)

    # Batch row tile: enforce multiple of 8, capped by the (padded) batch.
    tb = max(8, (int(block_rows) // 8) * 8)
    tb = min(tb, _round_up(B, 8))
    B_pad = _round_up(B, tb)

    # Feature (K) tile: full F if it fits, else a 128-multiple K-tiled grid axis.
    if F <= block_k:
        tk, F_pad = F, F
    else:
        tk = max(128, (int(block_k) // 128) * 128)
        F_pad = _round_up(F, tk)

    # One-time (amortized) host-side padding / transpose / cast of the parameters.
    x_p = jnp.pad(x, ((0, B_pad - B), (0, F_pad - F))).astype(compute_dtype)
    t_p = jnp.pad(targets.astype(jnp.int32), (0, B_pad - B)).reshape(B_pad, 1)
    w_p = jnp.pad(weight.astype(jnp.float32),
                  ((0, CP - C), (0, F_pad - F))).T.astype(compute_dtype)   # (F_pad, CP)
    if bias is None:
        b_p = jnp.zeros((1, CP), jnp.float32)
    else:
        b_p = jnp.pad(bias.astype(jnp.float32), (0, CP - C)).reshape(1, CP)

    grid = (B_pad // tb, F_pad // tk)
    kernel = _make_logreg_kernel(C)

    # VMEM footprint estimate (double-buffered inputs/output + accumulator); only
    # raise the scoped limit when the blocks actually need it (v7x: 64 MiB physical).
    elt = jnp.dtype(compute_dtype).itemsize
    vmem_est = (2 * (tb * tk + tk * CP) * elt     # x / w blocks (double-buffered)
                + 2 * (tb + CP) * 4               # targets / bias blocks
                + 2 * tb * CP * 4                 # output block (double-buffered)
                + tb * CP * 4)                    # f32 accumulator scratch
    compiler_kwargs = dict(dimension_semantics=("parallel", "arbitrary"))
    if vmem_est > (30 << 20):
        compiler_kwargs["vmem_limit_bytes"] = min(int(vmem_est * 3 // 2), 64 << 20)

    slab = pl.pallas_call(
        kernel,
        out_shape=jax.ShapeDtypeStruct((B_pad, CP), jnp.float32),
        grid_spec=pltpu.PrefetchScalarGridSpec(
            num_scalar_prefetch=0,
            grid=grid,
            in_specs=[
                pl.BlockSpec((tb, tk), lambda i, k: (i, k)),   # x row/feature tile
                pl.BlockSpec((tk, CP), lambda i, k: (k, 0)),   # weight slab (F-major)
                pl.BlockSpec((1, CP), lambda i, k: (0, 0)),    # bias (resident)
                pl.BlockSpec((tb, 1), lambda i, k: (i, 0)),    # targets for this row tile
            ],
            out_specs=pl.BlockSpec((tb, CP), lambda i, k: (i, 0)),
            scratch_shapes=[pltpu.VMEM((tb, CP), jnp.float32)],
        ),
        compiler_params=pltpu.CompilerParams(**compiler_kwargs),
        cost_estimate=pl.CostEstimate(
            flops=2 * B_pad * F_pad * CP,
            transcendentals=B_pad * CP + B_pad,
            bytes_accessed=elt * (B_pad * F_pad + F_pad * CP)
                           + 4 * (CP + B_pad + B_pad * CP),
        ),
    )(x_p, w_p, b_p, t_p)

    logits = slab[:B, :C]
    loss = jnp.mean(slab[:B, C])     # tiny final reduction fused into surrounding XLA
    return loss, logits


if __name__ == "__main__":
    def ref_forward(x, weight, bias, targets):
        logits = x @ weight.T + bias
        lse = jax.scipy.special.logsumexp(logits, axis=-1)
        loss = jnp.mean(lse - logits[jnp.arange(x.shape[0]), targets])
        return loss, logits

    key = jax.random.PRNGKey(0)

    # ---- Case 1: small config matching LogReg(num_features=32, num_classes=10, bias=True),
    # single K step, f32 matmul (tight tolerance). ----
    num_features, num_classes, batch = 32, 10, 8
    k_x, k_t, k_w, k_b, key = jax.random.split(key, 5)
    bound = 1.0 / (num_features ** 0.5)
    weight = jax.random.uniform(k_w, (num_classes, num_features),
                                minval=-bound, maxval=bound, dtype=jnp.float32)
    bias = jax.random.uniform(k_b, (num_classes,),
                              minval=-bound, maxval=bound, dtype=jnp.float32)
    x = jax.random.normal(k_x, (batch, num_features), dtype=jnp.float32)
    targets = jax.random.randint(k_t, (batch,), 0, num_classes, dtype=jnp.int32)

    fwd = jax.jit(functools.partial(logreg_forward, block_rows=256))
    loss, out = fwd(x, weight, bias, targets)
    jax.block_until_ready((loss, out))
    loss_ref, out_ref = ref_forward(x, weight, bias, targets)
    assert jnp.allclose(out, out_ref, atol=1e-5), "logits mismatch (f32)"
    assert jnp.allclose(loss, loss_ref, atol=1e-4), "loss mismatch (f32)"

    # ---- Case 2: F > block_k exercises the K-tiled accumulator path. ----
    nf2, nc2, b2 = 384, 10, 32
    k_x2, k_t2, k_w2, k_b2, key = jax.random.split(key, 5)
    bound2 = 1.0 / (nf2 ** 0.5)
    weight2 = jax.random.uniform(k_w2, (nc2, nf2), minval=-bound2, maxval=bound2,
                                 dtype=jnp.float32)
    bias2 = jax.random.uniform(k_b2, (nc2,), minval=-bound2, maxval=bound2,
                               dtype=jnp.float32)
    x2 = jax.random.normal(k_x2, (b2, nf2), dtype=jnp.float32)
    targets2 = jax.random.randint(k_t2, (b2,), 0, nc2, dtype=jnp.int32)

    fwd2 = jax.jit(functools.partial(logreg_forward, block_rows=256, block_k=128))
    loss2, out2 = fwd2(x2, weight2, bias2, targets2)
    jax.block_until_ready((loss2, out2))
    loss2_ref, out2_ref = ref_forward(x2, weight2, bias2, targets2)
    assert jnp.allclose(out2, out2_ref, atol=1e-2), "logits mismatch (K-tiled)"
    assert jnp.allclose(loss2, loss2_ref, atol=1e-2), "loss mismatch (K-tiled)"

    # ---- Case 3: bf16 matmul path (v6e/v7x MXU-native); loss math stays f32. ----
    fwd3 = jax.jit(functools.partial(logreg_forward, block_rows=256,
                                     compute_dtype=jnp.bfloat16))
    loss3, out3 = fwd3(x, weight, bias, targets)
    jax.block_until_ready((loss3, out3))
    assert jnp.allclose(out3, out_ref, atol=5e-2), "logits mismatch (bf16)"
    assert jnp.allclose(loss3, loss_ref, atol=5e-2), "loss mismatch (bf16)"

    print("KERNEL_OK")
</pallas_src>

<mosaic_0001>
module attributes {stable_mosaic.version = 11 : i64} {
  func.func @kernel(%arg0: i32, %arg1: i32, %arg2: memref<8x32xf32, #tpu.memory_space<vmem>>, %arg3: memref<32x128xf32, #tpu.memory_space<vmem>>, %arg4: memref<1x128xf32, #tpu.memory_space<vmem>>, %arg5: memref<8x1xi32, #tpu.memory_space<vmem>>, %arg6: memref<8x128xf32, #tpu.memory_space<vmem>>, %arg7: memref<8x128xf32, #tpu.memory_space<vmem>>) attributes {dimension_semantics = [#tpu.dimension_semantics<parallel>, #tpu.dimension_semantics<arbitrary>], iteration_bounds = array<i64: 1, 1>, scalar_prefetch = 0 : i64, scratch_operands = 1 : i64, tpu.core_type = #tpu.core_type<tc>, window_params = [{transform_indices = @transform_0, window_bounds = array<i64: 8, 32>}, {transform_indices = @transform_1, window_bounds = array<i64: 32, 128>}, {pipeline_mode = #tpu.pipeline_mode<synchronous>, transform_indices = @transform_2, window_bounds = array<i64: 1, 128>}, {transform_indices = @transform_3, window_bounds = array<i64: 8, 1>}, {transform_indices = @transform_4, window_bounds = array<i64: 8, 128>}]} {
    %c0_i32 = arith.constant 0 : i32
    %0 = arith.cmpi eq, %arg1, %c0_i32 : i32
    %1 = arith.extui %0 : i1 to i32
    %c0_i32_0 = arith.constant 0 : i32
    %2 = arith.cmpi ne, %1, %c0_i32_0 : i32
    scf.if %2 {
      %cst_10 = arith.constant 0.000000e+00 : f32
      %12 = vector.broadcast %cst_10 : f32 to vector<8x128xf32>
      %c0_11 = arith.constant 0 : index
      %c0_12 = arith.constant 0 : index
      %13 = vector.load %arg7[%c0_11, %c0_12] : memref<8x128xf32, #tpu.memory_space<vmem>>, vector<8x128xf32>
      tpu.vector_store %arg7[%c0_11, %c0_12], %12 {strides = array<i32>} : memref<8x128xf32, #tpu.memory_space<vmem>>, vector<8x128xf32>,
    } else {
    }
    %c0 = arith.constant 0 : index
    %c0_1 = arith.constant 0 : index
    %3 = vector.load %arg7[%c0, %c0_1] : memref<8x128xf32, #tpu.memory_space<vmem>>, vector<8x128xf32>
    %c0_2 = arith.constant 0 : index
    %c0_3 = arith.constant 0 : index
    %4 = vector.load %arg2[%c0_2, %c0_3] : memref<8x32xf32, #tpu.memory_space<vmem>>, vector<8x32xf32>
    %c0_4 = arith.constant 0 : index
    %c0_5 = arith.constant 0 : index
    %5 = vector.load %arg3[%c0_4, %c0_5] : memref<32x128xf32, #tpu.memory_space<vmem>>, vector<32x128xf32>
    %cst = arith.constant dense<0.000000e+00> : vector<8x128xf32>
    %6 = tpu.matmul %4, %5, %cst {dimension_numbers = #tpu.dot_dimension_numbers<[1], [0], [0], [1], [0, 0, 1, 1], [], []>} : vector<8x32xf32>, vector<32x128xf32>, vector<8x128xf32> -> vector<8x128xf32>
    %7 = arith.addf %3, %6 : vector<8x128xf32>
    %c0_6 = arith.constant 0 : index
    %c0_7 = arith.constant 0 : index
    %8 = vector.load %arg7[%c0_6, %c0_7] : memref<8x128xf32, #tpu.memory_space<vmem>>, vector<8x128xf32>
    tpu.vector_store %arg7[%c0_6, %c0_7], %7 {strides = array<i32>} : memref<8x128xf32, #tpu.memory_space<vmem>>, vector<8x128xf32>,
    %c0_i32_8 = arith.constant 0 : i32
    %9 = arith.cmpi eq, %arg1, %c0_i32_8 : i32
    %10 = arith.extui %9 : i1 to i32
    %c0_i32_9 = arith.constant 0 : i32
    %11 = arith.cmpi ne, %10, %c0_i32_9 : i32
    scf.if %11 {
      %c0_10 = arith.constant 0 : index
      %c0_11 = arith.constant 0 : index
      %12 = vector.load %arg7[%c0_10, %c0_11] : memref<8x128xf32, #tpu.memory_space<vmem>>, vector<8x128xf32>
      %c0_12 = arith.constant 0 : index
      %c0_13 = arith.constant 0 : index
      %13 = vector.load %arg4[%c0_12, %c0_13] : memref<1x128xf32, #tpu.memory_space<vmem>>, vector<1x128xf32>
      %14 = vector.broadcast %13 : vector<1x128xf32> to vector<8x128xf32>
      %15 = arith.addf %12, %14 : vector<8x128xf32>
      %16 = tpu.iota {dimensions = array<i32: 1>} : vector<8x128xi32>
      %c10_i32 = arith.constant 10 : i32
      %17 = vector.broadcast %c10_i32 : i32 to vector<8x128xi32>
      %18 = arith.cmpi slt, %16, %17 : vector<8x128xi32>
      %cst_14 = arith.constant 0xFF800000 : f32
      %19 = vector.broadcast %cst_14 : f32 to vector<8x128xf32>
      %20 = arith.select %18, %15, %19 : vector<8x128xi1>, vector<8x128xf32>
      %cst_15 = arith.constant dense<0xFF800000> : vector<8xf32>
      %21 = vector.multi_reduction <maximumf>, %20, %cst_15 [1] : vector<8x128xf32> to vector<8xf32>
      %22 = vector.shape_cast %21 : vector<8xf32> to vector<8x1xf32>
      %23 = vector.broadcast %22 : vector<8x1xf32> to vector<8x128xf32>
      %24 = arith.subf %20, %23 : vector<8x128xf32>
      %25 = math.exp %24 : vector<8x128xf32>
      %cst_16 = arith.constant dense<0.000000e+00> : vector<8xf32>
      %26 = vector.multi_reduction <add>, %25, %cst_16 [1] : vector<8x128xf32> to vector<8xf32>
      %27 = vector.shape_cast %26 : vector<8xf32> to vector<8x1xf32>
      %28 = math.log %27 : vector<8x1xf32>
      %29 = arith.addf %22, %28 : vector<8x1xf32>
      %c0_17 = arith.constant 0 : index
      %c0_18 = arith.constant 0 : index
      %30 = vector.load %arg5[%c0_17, %c0_18] : memref<8x1xi32, #tpu.memory_space<vmem>>, vector<8x1xi32>
      %31 = vector.broadcast %30 : vector<8x1xi32> to vector<8x128xi32>
      %32 = arith.cmpi eq, %16, %31 : vector<8x128xi32>
      %cst_19 = arith.constant 0.000000e+00 : f32
      %33 = vector.broadcast %cst_19 : f32 to vector<8x128xf32>
      %34 = arith.select %32, %15, %33 : vector<8x128xi1>, vector<8x128xf32>
      %cst_20 = arith.constant dense<0.000000e+00> : vector<8xf32>
      %35 = vector.multi_reduction <add>, %34, %cst_20 [1] : vector<8x128xf32> to vector<8xf32>
      %36 = vector.shape_cast %35 : vector<8xf32> to vector<8x1xf32>
      %37 = arith.subf %29, %36 : vector<8x1xf32>
      %c10_i32_21 = arith.constant 10 : i32
      %38 = vector.broadcast %c10_i32_21 : i32 to vector<8x128xi32>
      %39 = arith.cmpi eq, %16, %38 : vector<8x128xi32>
      %40 = vector.shape_cast %37 : vector<8x1xf32> to vector<8x1xf32>
      %41 = vector.broadcast %40 : vector<8x1xf32> to vector<8x128xf32>
      %42 = arith.select %39, %41, %15 : vector<8x128xi1>, vector<8x128xf32>
      %c0_22 = arith.constant 0 : index
      %c0_23 = arith.constant 0 : index
      %43 = vector.load %arg6[%c0_22, %c0_23] : memref<8x128xf32, #tpu.memory_space<vmem>>, vector<8x128xf32>
      tpu.vector_store %arg6[%c0_22, %c0_23], %42 {strides = array<i32>} : memref<8x128xf32, #tpu.memory_space<vmem>>, vector<8x128xf32>,
    } else {
    }
    return
  }
  func.func @transform_0(%arg0: i32, %arg1: i32) -> (i32, i32) {
    %c0_i32 = arith.constant 0 : i32
    return %arg0, %arg1 : i32, i32
  }
  func.func @transform_1(%arg0: i32, %arg1: i32) -> (i32, i32) {
    %c0_i32 = arith.constant 0 : i32
    %c0_i32_0 = arith.constant 0 : i32
    return %arg1, %c0_i32 : i32, i32
  }
  func.func @transform_2(%arg0: i32, %arg1: i32) -> (i32, i32) {
    %c0_i32 = arith.constant 0 : i32
    %c0_i32_0 = arith.constant 0 : i32
    %c0_i32_1 = arith.constant 0 : i32
    return %c0_i32, %c0_i32_0 : i32, i32
  }
  func.func @transform_3(%arg0: i32, %arg1: i32) -> (i32, i32) {
    %c0_i32 = arith.constant 0 : i32
    %c0_i32_0 = arith.constant 0 : i32
    return %arg0, %c0_i32 : i32, i32
  }
  func.func @transform_4(%arg0: i32, %arg1: i32) -> (i32, i32) {
    %c0_i32 = arith.constant 0 : i32
    %c0_i32_0 = arith.constant 0 : i32
    return %arg0, %c0_i32 : i32, i32
  }
}

</mosaic_0001>

<bundles_post_ra>
// kernel: logreg_forward.1
= control target key start
LH: loop header
LB: loop body
LE: loop exit
PB: predicated region body
PF: predicated region fallthrough
CT: control target
= control target key end

     0   :  { %v179_v0 = vmov 0.0|0.0   ;;  %vm180_vm0 = vmmov 0   ;;  %v181_v4 = vmov 0.0   ;;  %vm28_vm1 = vcmask 261120   ;;  %s232_s1 = inlined_call_operand.vmem [shape: f32[32,128], index: 1, kind: input, shape index: {}]   ;;  %s233_s0 = inlined_call_operand.vmem [shape: f32[8,32], index: 0, kind: input, shape index: {}]   ;;  %s234_s2 = inlined_call_operand.vmem [shape: f32[1,128], index: 2, kind: input, shape index: {}]   ;;  %s235_s3 = inlined_call_operand.vmem [shape: s32[8,1], index: 3, kind: input, shape index: {}]   ;;  %s236_s4 = inlined_call_operand.vmem [shape: f32[8,128], index: 4, kind: output, shape index: {}]  }
   0x1   :  { %164 = vmatprep.subr.bf16.mxu0 %v179_v0  ;;  %v24_v1 = vld [vmem:[%s232_s1] sm:$0xff]  ;;  %v25_v2 = vld [vmem:[%s232_s1 + $0x8] sm:$0xff]  ;;  %v26_v3 = vld [vmem:[%s232_s1 + $0x10] sm:$0xff]  ;;  %161 = vmatprep.mubr.msk.f32.mxu0 %vm180_vm0, %v181_v4  ;;  %v182_v9 = vmov 0   ;;  %v116_v10 = vlaneseq }
   0x2   :  { %v165_v5 = vpack.c.bf16 %v25_v2, %v24_v1  ;;  %v27_v6 = vld [vmem:[%s232_s1 + $0x18] sm:$0xff]  ;;  %v23_v8 = vld [vmem:[%s233_s0] sm:$0xff]  ;;  %174 = vset.pattern.permute.xlu0 %v182_v9 }
   0x3   :  { %v168_v7 = vpack.c.bf16 %v27_v6, %v26_v3  ;;  %v117_v11 = vand.u32 127, %v116_v10  ;;  %v147_v12 = vld [vmem:[%s234_s2] ss:$0 sm:$0xff] }
   0x4   :  { %166 = vmatpush3.bf16.msra.mxu0 %v165_v5  ;;  %v130_v17 = vld [vmem:[%s235_s3] sm:$0xff] }
   0x5   :  { %167 = vmatprep.subr.bf16.mxu0 %v179_v0  ;;  %vm118_vm2 = vcmp.lt.s32.totalorder %v117_v11, 10  ;;  %vm139_vm4 = vcmp.eq.s32.totalorder %v117_v11, 10 }
   0x8   :  { %169 = vmatpush3.bf16.msra.mxu0 %v168_v7 }
   0xb   :  { %162 = vmatmul.mubr.msk.f32.vlgmr.msra.gmra.mrb[0].mxu0 %vm28_vm1, %v23_v8 }
  0xde   :  { %v98_v13 = vpop.f32.mrb[0].mxu0 }
  0xdf   :  { %v115_v14 = vadd.f32 %v147_v12, %v98_v13  ;;  %v163_v15 = vpop.f32.mrb[1].mxu0 }
  0xe1   :  { %v119_v16 = vsel %vm118_vm2, %v115_v14, -inf }
  0xe2   :  { %120 = vmax.xlane.f32.xlu0 %v119_v16 }
  0xf8   :  { %132 = vperm.xlu0 %174, %v130_v17  }
 0x16f   :  { %v121_v18 = vpop.xlane.xlu0 %120 }
 0x170   :  { %v122_v19 = vsub.f32 %v119_v16, %v121_v18 }
 0x172   :  { %v123_v20 = vmul.f32 1.442695, %v122_v19 }
 0x174   :  { %175 = vpow2.f32 %v123_v20 }
 0x177   :  { %v133_v21 = vpop.permute.xlu0 %132 }
 0x178   :  { %vm134_vm3 = vcmp.eq.s32.totalorder %v117_v11, %v133_v21 }
 0x179   :  { %v135_v23 = vsel %vm134_vm3, %v115_v14, 0.0 }
 0x17e   :  { %v176_v22 = vpop.eup %175 }
 0x17f   :  { %125 = vadd.xlane.f32.xlu1 %v176_v22 }
 0x183   :  { %136 = vadd.xlane.f32.xlu1 %v135_v23 }
 0x20c   :  { %v126_v24 = vpop.xlane.xlu1 %125 }
 0x20d   :  { %177 = vlog2.f32 %v126_v24 }
 0x210   :  { %v137_v28 = vpop.xlane.xlu1 %136 }
 0x217   :  { %v178_v25 = vpop.eup %177 }
 0x218   :  { %v128_v26 = vmul.f32 0.6931472, %v178_v25 }
 0x21a   :  { %v129_v27 = vadd.f32 %v128_v26, %v121_v18 }
 0x21c   :  { %v138_v29 = vsub.f32 %v129_v27, %v137_v28 }
 0x21e   :  { %v140_v30 = vsel %vm139_vm4, %v138_v29, %v115_v14 }
 0x21f   :  { %141 = vst [vmem:[%s236_s4] sm:$0xff] %v140_v30 }

</bundles_post_ra>
